<compile_context>
chip_gen: v7x
topology: tpu7x:2x2x1
jax: 0.10.0
libtpu: 0.0.40
codegen_flags: <defaults>
</compile_context>

<pallas_src>
import jax
import jax.numpy as jnp
from jax.experimental import pallas as pl
from jax.experimental.pallas import tpu as pltpu

KERNEL_SIZES = (3, 4, 5)
KMAX = max(KERNEL_SIZES)


# ------------------------------ fused kernel ------------------------------- #

def _make_kernel(bb, L, H, C, n_classes):
    """Fused TextCNN kernel for a batch-block of `bb` sequences of length L."""
    BL = bb * L
    C3 = 3 * C

    def kernel(tok_ref,            # (B*L,) i32 in SMEM (scalar prefetch)
               emb_hbm,            # (V, H) f32, memory_space=ANY (HBM)
               convw_ref,          # (KMAX*H, 3C) bf16 fused conv weight
               fcw_ref,            # (3C, n_classes) bf16
               bias_ref,           # (1, 3C + n_classes) f32 packed biases
               out_ref,            # (1, bb, n_classes) f32
               emb_buf,            # VMEM (BL + KMAX - 1, H) f32 scratch
               sem):               # DMA semaphore (1,)
        base = pl.program_id(0) * BL

        # Zero the KMAX-1 pad rows once (they only feed conv positions that
        # static-slice pooling excludes, but keep them deterministic).
        emb_buf[pl.ds(BL, KMAX - 1), :] = jnp.zeros((KMAX - 1, H), jnp.float32)

        # ---- embedding lookup: per-row DMA gather HBM -> VMEM scratch ----
        @pl.loop(0, BL)
        def _issue(i):
            row = tok_ref[base + i]
            pltpu.make_async_copy(emb_hbm.at[pl.ds(row, 1), :],
                                  emb_buf.at[pl.ds(i, 1), :],
                                  sem.at[0]).start()

        @pl.loop(0, BL)
        def _drain(i):
            # Same-sized descriptor; one wait per issued copy.
            pltpu.make_async_copy(emb_hbm.at[pl.ds(0, 1), :],
                                  emb_buf.at[pl.ds(0, 1), :],
                                  sem.at[0]).wait()

        # ---- im2col in f32, single bf16 cast, ONE fused conv matmul ----
        # patches[:, j*H + h] == emb[t + j, h]
        patches = jnp.concatenate(
            [emb_buf[pl.ds(j, BL), :] for j in range(KMAX)], axis=1)  # (BL, 5H) f32
        z = jnp.dot(patches.astype(jnp.bfloat16), convw_ref[...],
                    preferred_element_type=jnp.float32)               # (BL, 3C) f32
        z3 = z.reshape(bb, L, C3)

        biases = bias_ref[...]                                        # (1, 3C+NCLS)
        conv_b = biases[:, :C3]                                       # (1, 3C)
        fc_b = biases[:, C3:]                                         # (1, NCLS)

        # Per-branch global max-pool over the statically valid positions only.
        p3 = jnp.max(z3[:, :L - KERNEL_SIZES[0] + 1, 0 * C:1 * C], axis=1)
        p4 = jnp.max(z3[:, :L - KERNEL_SIZES[1] + 1, 1 * C:2 * C], axis=1)
        p5 = jnp.max(z3[:, :L - KERNEL_SIZES[2] + 1, 2 * C:3 * C], axis=1)
        feat = jnp.concatenate([p3, p4, p5], axis=1)                  # (bb, 3C)
        # maxpool(relu(conv + b)) == relu(max(conv) + b)
        feat = jnp.maximum(feat + conv_b, 0.0)

        # TODO(synk): nn.Dropout(0.8) is eval-mode identity here; training-mode
        # dropout would use pltpu.prng_seed / pltpu.stateful_bernoulli.
        logits = jnp.dot(feat.astype(jnp.bfloat16), fcw_ref[...],
                         preferred_element_type=jnp.float32) + fc_b   # (bb, NCLS)

        # log_softmax over classes (f32)
        m = jnp.max(logits, axis=1, keepdims=True)
        shifted = logits - m
        lse = jnp.log(jnp.sum(jnp.exp(shifted), axis=1, keepdims=True))
        out_ref[0] = shifted - lse

    return kernel


# ------------------------------ forward wrapper ---------------------------- #

def textcnn_forward(params, text, text_lengths=None, num_batch_blocks=None):
    """TextCNN forward.  `text_lengths` is accepted but unused, matching the
    PyTorch reference (its forward ignores text_lengths)."""
    del text_lengths
    B, L = text.shape
    V, H = params["embedding"].shape
    C = params["conv3_b"].shape[0]
    n_classes = params["fc_b"].shape[0]
    assert L >= KMAX

    if num_batch_blocks is None:
        # Single grid step on single-TC chips / small batches (no per-step
        # overhead, no replicated-weight refetch).  Only split across the two
        # v7x TensorCores when there is real per-block work.
        num_batch_blocks = 2 if (B % 2 == 0 and B >= 128) else 1
    nb = num_batch_blocks
    assert B % nb == 0
    bb = B // nb
    BL = bb * L
    C3 = 3 * C

    # ---- host-side constant packing (cheap, runs once under jit) ----
    tok = text.astype(jnp.int32).reshape(B * L)          # scalar-prefetch operand
    emb = params["embedding"].astype(jnp.float32)        # (V, H), stays in HBM

    def conv_rows(w):  # (C, H, k) -> (k*H, C) with [j*H + h, c] = w[c, h, j]
        C_, H_, k_ = w.shape
        return jnp.transpose(w, (2, 1, 0)).reshape(k_ * H_, C_)

    # Fused conv weight: branch k occupies rows 0:k*H of column block k; the
    # remaining rows are zero, so shifts j >= k contribute nothing exactly.
    W = jnp.zeros((KMAX * H, C3), jnp.float32)
    for bi, k in enumerate(KERNEL_SIZES):
        W = W.at[:k * H, bi * C:(bi + 1) * C].set(conv_rows(params[f"conv{k}_w"]))
    W = W.astype(jnp.bfloat16)                            # (5H, 3C)

    wf = params["fc_w"].T.astype(jnp.bfloat16)            # (3C, NCLS)
    bias_slab = jnp.concatenate(
        [params["conv3_b"], params["conv4_b"], params["conv5_b"], params["fc_b"]]
    ).reshape(1, C3 + n_classes).astype(jnp.float32)      # (1, 3C + NCLS)

    kernel = _make_kernel(bb, L, H, C, n_classes)
    rep = lambda i, tok_ref: (0, 0)  # replicated weights / biases

    out = pl.pallas_call(
        kernel,
        out_shape=jax.ShapeDtypeStruct((nb, bb, n_classes), jnp.float32),
        grid_spec=pltpu.PrefetchScalarGridSpec(
            num_scalar_prefetch=1,
            grid=(nb,),
            in_specs=[
                pl.BlockSpec(memory_space=pl.ANY),          # embedding table (HBM)
                pl.BlockSpec((KMAX * H, C3), rep),          # fused conv weight
                pl.BlockSpec((C3, n_classes), rep),         # fc weight
                pl.BlockSpec((1, C3 + n_classes), rep),     # packed biases
            ],
            out_specs=pl.BlockSpec((1, bb, n_classes),
                                   lambda i, tok_ref: (i, 0, 0)),
            scratch_shapes=[
                pltpu.VMEM((BL + KMAX - 1, H), jnp.float32),
                pltpu.SemaphoreType.DMA((1,)),
            ]),
        compiler_params=pltpu.CompilerParams(
            dimension_semantics=("arbitrary",) if nb == 1 else ("parallel",)),
    )(tok, emb, W, wf, bias_slab)
    return out.reshape(B, n_classes)


# ------------------------- pure-JAX reference (check) ----------------------- #

def textcnn_reference(params, text):
    emb = params["embedding"][text]                       # (B, L, H)
    x = jnp.transpose(emb, (0, 2, 1))                     # (B, H, L)
    feats = []
    for k in KERNEL_SIZES:
        z = jax.lax.conv_general_dilated(
            x, params[f"conv{k}_w"], window_strides=(1,), padding="VALID",
            dimension_numbers=("NCH", "OIH", "NCH"),
            precision=jax.lax.Precision.HIGHEST)          # (B, C, L-k+1)
        z = z + params[f"conv{k}_b"][None, :, None]
        feats.append(jnp.max(jax.nn.relu(z), axis=-1))    # (B, C)
    feat = jnp.concatenate(feats, axis=1)                 # (B, 3C)
    logits = jnp.dot(feat, params["fc_w"].T,
                     precision=jax.lax.Precision.HIGHEST) + params["fc_b"]
    return jax.nn.log_softmax(logits, axis=-1)


# --------------------------------- init ------------------------------------ #

def init_params(key, vocab_size=1000, hidden_dim=32, num_channels=32,
                num_classes=10):
    """PyTorch-style init: Embedding ~ N(0,1) with padding row zeroed;
    Conv1d/Linear ~ U(-1/sqrt(fan_in), 1/sqrt(fan_in))."""
    keys = jax.random.split(key, 9)
    params = {}
    emb = jax.random.normal(keys[0], (vocab_size, hidden_dim), jnp.float32)
    params["embedding"] = emb.at[0].set(0.0)   # padding_idx = 0

    def u(k, shape, fan_in):
        b = 1.0 / jnp.sqrt(jnp.float32(fan_in))
        return jax.random.uniform(k, shape, jnp.float32, -b, b)

    idx = 1
    for k in KERNEL_SIZES:
        fan = hidden_dim * k
        params[f"conv{k}_w"] = u(keys[idx], (num_channels, hidden_dim, k), fan); idx += 1
        params[f"conv{k}_b"] = u(keys[idx], (num_channels,), fan); idx += 1
    fan = num_channels * len(KERNEL_SIZES)
    params["fc_w"] = u(keys[idx], (num_classes, fan), fan); idx += 1
    params["fc_b"] = u(keys[idx], (num_classes,), fan)
    return params


# --------------------------------- main ------------------------------------ #

if __name__ == "__main__":
    key = jax.random.PRNGKey(0)
    pkey, tkey = jax.random.split(key)

    # Small shapes consistent with the module: batch=2, max_len=32, hidden=32,
    # num_channels=32, vocab=1000, num_classes=10, kernels (3, 4, 5).
    B, L, VOCAB = 2, 32, 1000
    params = init_params(pkey, vocab_size=VOCAB, hidden_dim=32,
                         num_channels=32, num_classes=10)
    text = jax.random.randint(tkey, (B, L), 0, VOCAB, jnp.int32)
    text_lengths = jnp.full((B,), L, jnp.int32)

    y = jax.jit(textcnn_forward)(params, text, text_lengths)
    y = jax.block_until_ready(y)
    y_ref = jax.block_until_ready(jax.jit(textcnn_reference)(params, text))

    assert y.shape == (B, 10) and y.dtype == jnp.float32
    assert bool(jnp.all(jnp.isfinite(y)))
    # log_softmax rows must exponentiate to (approximately) a probability dist.
    assert bool(jnp.all(jnp.abs(jnp.sum(jnp.exp(y), axis=1) - 1.0) < 1e-3))
    # bf16 matmuls vs f32 reference: loose tolerance.
    assert bool(jnp.allclose(y, y_ref, atol=5e-2, rtol=5e-2))
    print("KERNEL_OK")
</pallas_src>

<mosaic_0001>
module attributes {stable_mosaic.version = 11 : i64} {
  func.func @kernel(%arg0: i32, %arg1: memref<64xi32, #tpu.memory_space<smem>>, %arg2: memref<1000x32xf32, #tpu.memory_space<any>>, %arg3: memref<160x96xbf16, #tpu.memory_space<vmem>>, %arg4: memref<96x10xbf16, #tpu.memory_space<vmem>>, %arg5: memref<1x106xf32, #tpu.memory_space<vmem>>, %arg6: memref<1x2x10xf32, #tpu.memory_space<vmem>>, %arg7: memref<68x32xf32, #tpu.memory_space<vmem>>, %arg8: memref<1x!tpu.dma_semaphore, #tpu.memory_space<semaphore_mem>>) attributes {dimension_semantics = [#tpu.dimension_semantics<arbitrary>], iteration_bounds = array<i64: 1>, scalar_prefetch = 1 : i64, scratch_operands = 2 : i64, tpu.core_type = #tpu.core_type<tc>, window_params = [{}, {pipeline_mode = #tpu.pipeline_mode<synchronous>, transform_indices = @transform_1, window_bounds = array<i64: 160, 96>}, {pipeline_mode = #tpu.pipeline_mode<synchronous>, transform_indices = @transform_2, window_bounds = array<i64: 96, 10>}, {pipeline_mode = #tpu.pipeline_mode<synchronous>, transform_indices = @transform_3, window_bounds = array<i64: 1, 106>}, {transform_indices = @transform_4, window_bounds = array<i64: 1, 2, 10>}]} {
    %c64_i32 = arith.constant 64 : i32
    %0 = arith.muli %arg0, %c64_i32 : i32
    %cst = arith.constant 0.000000e+00 : f32
    %1 = vector.broadcast %cst : f32 to vector<4x32xf32>
    %c64 = arith.constant 64 : index
    %c0 = arith.constant 0 : index
    %2 = vector.load %arg7[%c64, %c0] : memref<68x32xf32, #tpu.memory_space<vmem>>, vector<4x32xf32>
    tpu.vector_store %arg7[%c64, %c0], %1 {strides = array<i32>} : memref<68x32xf32, #tpu.memory_space<vmem>>, vector<4x32xf32>,
    %c0_i32 = arith.constant 0 : i32
    %c64_i32_0 = arith.constant 64 : i32
    %3 = arith.addi %c0_i32, %c64_i32_0 : i32
    %c1_i32 = arith.constant 1 : i32
    scf.for %arg9 = %c0_i32 to %3 step %c1_i32  : i32 {
      %c1_i32_28 = arith.constant 1 : i32
      %47 = arith.muli %arg9, %c1_i32_28 : i32
      %c0_i32_29 = arith.constant 0 : i32
      %48 = arith.addi %c0_i32_29, %47 : i32
      %49 = arith.addi %0, %48 : i32
      %50 = arith.index_cast %49 : i32 to index
      %51 = memref.load %arg1[%50] : memref<64xi32, #tpu.memory_space<smem>>
      %c0_i32_30 = arith.constant 0 : i32
      %c0_i32_31 = arith.constant 0 : i32
      %52 = tpu.memref_slice %arg2[%51, %c0_i32_31] : memref<1000x32xf32, #tpu.memory_space<any>> -> memref<1x32xf32, #tpu.memory_space<any>>
      %c0_i32_32 = arith.constant 0 : i32
      %53 = tpu.memref_slice %arg7[%48, %c0_i32_32] : memref<68x32xf32, #tpu.memory_space<vmem>> -> memref<1x32xf32, #tpu.memory_space<vmem>>
      %54 = tpu.memref_slice %arg8[%c0_i32_30] : memref<1x!tpu.dma_semaphore, #tpu.memory_space<semaphore_mem>> -> memref<1x!tpu.dma_semaphore, #tpu.memory_space<semaphore_mem>>
      %55 = tpu.memref_squeeze %54 : memref<1x!tpu.dma_semaphore, #tpu.memory_space<semaphore_mem>> -> memref<!tpu.dma_semaphore, #tpu.memory_space<semaphore_mem>>
      tpu.enqueue_dma source(%52 : memref<1x32xf32, #tpu.memory_space<any>>) target(%53 : memref<1x32xf32, #tpu.memory_space<vmem>>) target_semaphore(%55 : memref<!tpu.dma_semaphore, #tpu.memory_space<semaphore_mem>>)
    }
    %c64_i32_1 = arith.constant 64 : i32
    %c0_i32_2 = arith.constant 0 : i32
    %c64_i32_3 = arith.constant 64 : i32
    %4 = arith.addi %c0_i32_2, %c64_i32_3 : i32
    %c1_i32_4 = arith.constant 1 : i32
    scf.for %arg9 = %c0_i32_2 to %4 step %c1_i32_4  : i32 {
      %c0_i32_28 = arith.constant 0 : i32
      %c0_i32_29 = arith.constant 0 : i32
      %c0_i32_30 = arith.constant 0 : i32
      %47 = tpu.memref_slice %arg2[%c0_i32_29, %c0_i32_30] : memref<1000x32xf32, #tpu.memory_space<any>> -> memref<1x32xf32, #tpu.memory_space<any>>
      %c0_i32_31 = arith.constant 0 : i32
      %c0_i32_32 = arith.constant 0 : i32
      %48 = tpu.memref_slice %arg7[%c0_i32_31, %c0_i32_32] : memref<68x32xf32, #tpu.memory_space<vmem>> -> memref<1x32xf32, #tpu.memory_space<vmem>>
      %49 = tpu.memref_slice %arg8[%c0_i32_28] : memref<1x!tpu.dma_semaphore, #tpu.memory_space<semaphore_mem>> -> memref<1x!tpu.dma_semaphore, #tpu.memory_space<semaphore_mem>>
      %50 = tpu.memref_squeeze %49 : memref<1x!tpu.dma_semaphore, #tpu.memory_space<semaphore_mem>> -> memref<!tpu.dma_semaphore, #tpu.memory_space<semaphore_mem>>
      tpu.wait_dma2 semaphore(%50 : memref<!tpu.dma_semaphore, #tpu.memory_space<semaphore_mem>>) src(%47 : memref<1x32xf32, #tpu.memory_space<any>>) dst(%48 : memref<1x32xf32, #tpu.memory_space<vmem>>)
    }
    %c0_5 = arith.constant 0 : index
    %c0_6 = arith.constant 0 : index
    %5 = vector.load %arg7[%c0_5, %c0_6] : memref<68x32xf32, #tpu.memory_space<vmem>>, vector<64x32xf32>
    %c1 = arith.constant 1 : index
    %c0_7 = arith.constant 0 : index
    %6 = vector.load %arg7[%c1, %c0_7] : memref<68x32xf32, #tpu.memory_space<vmem>>, vector<64x32xf32>
    %c2 = arith.constant 2 : index
    %c0_8 = arith.constant 0 : index
    %7 = vector.load %arg7[%c2, %c0_8] : memref<68x32xf32, #tpu.memory_space<vmem>>, vector<64x32xf32>
    %c3 = arith.constant 3 : index
    %c0_9 = arith.constant 0 : index
    %8 = vector.load %arg7[%c3, %c0_9] : memref<68x32xf32, #tpu.memory_space<vmem>>, vector<64x32xf32>
    %c4 = arith.constant 4 : index
    %c0_10 = arith.constant 0 : index
    %9 = vector.load %arg7[%c4, %c0_10] : memref<68x32xf32, #tpu.memory_space<vmem>>, vector<64x32xf32>
    %10 = tpu.concatenate %5, %6, %7, %8, %9 in 1 : vector<64x32xf32>, vector<64x32xf32>, vector<64x32xf32>, vector<64x32xf32>, vector<64x32xf32> -> vector<64x160xf32>
    %11 = arith.truncf %10 : vector<64x160xf32> to vector<64x160xbf16>
    %c0_11 = arith.constant 0 : index
    %c0_12 = arith.constant 0 : index
    %12 = vector.load %arg3[%c0_11, %c0_12] : memref<160x96xbf16, #tpu.memory_space<vmem>>, vector<160x96xbf16>
    %cst_13 = arith.constant dense<0.000000e+00> : vector<64x96xf32>
    %13 = tpu.matmul %11, %12, %cst_13 {dimension_numbers = #tpu.dot_dimension_numbers<[1], [0], [0], [1], [0, 0, 1, 1], [], []>} : vector<64x160xbf16>, vector<160x96xbf16>, vector<64x96xf32> -> vector<64x96xf32>
    %14 = vector.shape_cast %13 : vector<64x96xf32> to vector<2x32x96xf32>
    %c0_14 = arith.constant 0 : index
    %c0_15 = arith.constant 0 : index
    %15 = vector.load %arg5[%c0_14, %c0_15] : memref<1x106xf32, #tpu.memory_space<vmem>>, vector<1x106xf32>
    %16 = vector.extract_strided_slice %15 {offsets = [0, 0], sizes = [1, 96], strides = [1, 1]} : vector<1x106xf32> to vector<1x96xf32>
    %17 = vector.extract_strided_slice %15 {offsets = [0, 96], sizes = [1, 10], strides = [1, 1]} : vector<1x106xf32> to vector<1x10xf32>
    %18 = vector.extract_strided_slice %14 {offsets = [0, 0, 0], sizes = [2, 30, 32], strides = [1, 1, 1]} : vector<2x32x96xf32> to vector<2x30x32xf32>
    %cst_16 = arith.constant dense<0xFF800000> : vector<2x32xf32>
    %19 = vector.multi_reduction <maximumf>, %18, %cst_16 [1] : vector<2x30x32xf32> to vector<2x32xf32>
    %20 = vector.extract_strided_slice %14 {offsets = [0, 0, 32], sizes = [2, 29, 32], strides = [1, 1, 1]} : vector<2x32x96xf32> to vector<2x29x32xf32>
    %cst_17 = arith.constant dense<0xFF800000> : vector<2x32xf32>
    %21 = vector.multi_reduction <maximumf>, %20, %cst_17 [1] : vector<2x29x32xf32> to vector<2x32xf32>
    %22 = vector.extract_strided_slice %14 {offsets = [0, 0, 64], sizes = [2, 28, 32], strides = [1, 1, 1]} : vector<2x32x96xf32> to vector<2x28x32xf32>
    %cst_18 = arith.constant dense<0xFF800000> : vector<2x32xf32>
    %23 = vector.multi_reduction <maximumf>, %22, %cst_18 [1] : vector<2x28x32xf32> to vector<2x32xf32>
    %24 = tpu.concatenate %19, %21, %23 in 1 : vector<2x32xf32>, vector<2x32xf32>, vector<2x32xf32> -> vector<2x96xf32>
    %25 = vector.broadcast %16 : vector<1x96xf32> to vector<2x96xf32>
    %26 = arith.addf %24, %25 : vector<2x96xf32>
    %cst_19 = arith.constant 0.000000e+00 : f32
    %27 = vector.broadcast %cst_19 : f32 to vector<2x96xf32>
    %28 = arith.maximumf %26, %27 : vector<2x96xf32>
    %29 = arith.truncf %28 : vector<2x96xf32> to vector<2x96xbf16>
    %c0_20 = arith.constant 0 : index
    %c0_21 = arith.constant 0 : index
    %30 = vector.load %arg4[%c0_20, %c0_21] : memref<96x10xbf16, #tpu.memory_space<vmem>>, vector<96x10xbf16>
    %cst_22 = arith.constant dense<0.000000e+00> : vector<2x10xf32>
    %31 = tpu.matmul %29, %30, %cst_22 {dimension_numbers = #tpu.dot_dimension_numbers<[1], [0], [0], [1], [0, 0, 1, 1], [], []>} : vector<2x96xbf16>, vector<96x10xbf16>, vector<2x10xf32> -> vector<2x10xf32>
    %32 = vector.broadcast %17 : vector<1x10xf32> to vector<2x10xf32>
    %33 = arith.addf %31, %32 : vector<2x10xf32>
    %cst_23 = arith.constant dense<0xFF800000> : vector<2xf32>
    %34 = vector.multi_reduction <maximumf>, %33, %cst_23 [1] : vector<2x10xf32> to vector<2xf32>
    %35 = vector.shape_cast %34 : vector<2xf32> to vector<2x1xf32>
    %36 = vector.broadcast %35 : vector<2x1xf32> to vector<2x10xf32>
    %37 = arith.subf %33, %36 : vector<2x10xf32>
    %38 = math.exp %37 : vector<2x10xf32>
    %cst_24 = arith.constant dense<0.000000e+00> : vector<2xf32>
    %39 = vector.multi_reduction <add>, %38, %cst_24 [1] : vector<2x10xf32> to vector<2xf32>
    %40 = vector.shape_cast %39 : vector<2xf32> to vector<2x1xf32>
    %41 = math.log %40 : vector<2x1xf32>
    %42 = vector.broadcast %41 : vector<2x1xf32> to vector<2x10xf32>
    %43 = arith.subf %37, %42 : vector<2x10xf32>
    %c0_25 = arith.constant 0 : index
    %c0_26 = arith.constant 0 : index
    %c0_27 = arith.constant 0 : index
    %44 = vector.load %arg6[%c0_25, %c0_26, %c0_27] : memref<1x2x10xf32, #tpu.memory_space<vmem>>, vector<1x2x10xf32>
    %45 = vector.shape_cast %44 : vector<1x2x10xf32> to vector<2x10xf32>
    %46 = vector.shape_cast %43 : vector<2x10xf32> to vector<1x2x10xf32>
    tpu.vector_store %arg6[%c0_25, %c0_26, %c0_27], %46 {strides = array<i32>} : memref<1x2x10xf32, #tpu.memory_space<vmem>>, vector<1x2x10xf32>,
    return
  }
  func.func @transform_1(%arg0: i32, %arg1: memref<64xi32, #tpu.memory_space<smem>>) -> (i32, i32) {
    %c0_i32 = arith.constant 0 : i32
    %c0_i32_0 = arith.constant 0 : i32
    %c0_i32_1 = arith.constant 0 : i32
    return %c0_i32, %c0_i32_0 : i32, i32
  }
  func.func @transform_2(%arg0: i32, %arg1: memref<64xi32, #tpu.memory_space<smem>>) -> (i32, i32) {
    %c0_i32 = arith.constant 0 : i32
    %c0_i32_0 = arith.constant 0 : i32
    %c0_i32_1 = arith.constant 0 : i32
    return %c0_i32, %c0_i32_0 : i32, i32
  }
  func.func @transform_3(%arg0: i32, %arg1: memref<64xi32, #tpu.memory_space<smem>>) -> (i32, i32) {
    %c0_i32 = arith.constant 0 : i32
    %c0_i32_0 = arith.constant 0 : i32
    %c0_i32_1 = arith.constant 0 : i32
    return %c0_i32, %c0_i32_0 : i32, i32
  }
  func.func @transform_4(%arg0: i32, %arg1: memref<64xi32, #tpu.memory_space<smem>>) -> (i32, i32, i32) {
    %c0_i32 = arith.constant 0 : i32
    %c0_i32_0 = arith.constant 0 : i32
    %c0_i32_1 = arith.constant 0 : i32
    return %arg0, %c0_i32, %c0_i32_0 : i32, i32, i32
  }
}

</mosaic_0001>

<bundles_post_ra>
// kernel: textcnn_forward.1
= control target key start
LH: loop header
LB: loop body
LE: loop exit
PB: predicated region body
PF: predicated region fallthrough
CT: control target
= control target key end

     0   :  { %s1082_s0 = inlined_call_operand.vmem [shape: s32[64], index: 0, kind: input, shape index: {}]   ;;  %s1083_s1 = inlined_call_operand.vmem [shape: f32[1000,32], index: 1, kind: input, shape index: {}]   ;;  %s1084_s2 = inlined_call_operand.vmem [shape: bf16[160,96], index: 2, kind: input, shape index: {}]   ;;  %s1085_s3 = inlined_call_operand.vmem [shape: bf16[96,10], index: 3, kind: input, shape index: {}]   ;;  %s1086_s4 = inlined_call_operand.vmem [shape: f32[1,106], index: 4, kind: input, shape index: {}]   ;;  %s1087_s5 = inlined_call_operand.hbm [shape: f32[1,2,10], index: 5, kind: output, shape index: {}]  }
   0x1   :  { %s10_s20 = sshll.u32 %s1082_s0, 4  ;;  %s11_s20 = int_to_ptr.vmem [resolvable:$true] %s10_s20 }
   0x2   :  { %s826_s21 = scalar_lea.vmem %s11_s20, 16  ;;  %p831_p1 = scmp.lt.s32.totalorder %s11_s20, %s11_s20 }
   0x3   :  { %p827_p0 = scmp.ne.s32.totalorder %s11_s20, %s826_s21  ;;  %p832_p2 = scmp.lt.s32.totalorder %s826_s21, %s826_s21 }
   0x5   :  { %p833_p3 = por %p832_p2, %p831_p1 }
   0x7   :  { %p834_p4 = pnand %p833_p3, %p827_p0 }
   0x9   :  { %837 = shalt.err (!%p834_p4)  }
   0xa   :  { %s882_s22 = smov [#allocation5]  }
   0xb   :  { %13 = dma.vmem_to_smem %s11_s20, 16, %s882_s22, [#allocation4] }
   0xc   :  { %868 = dma.done.wait [#allocation4], 16 }
   0xd   :  { %869 = vsyncadd [#allocation4], 4294967280 }
   0xe   :  { %15 = sfence }
   0xf   :  { %16 = vsyncpa [#allocation7], 0  ;;  %vm25_vm0 = vcmask 257024   ;;  %v883_v0 = vmov 0.0   ;;  %s874_s23 = smov 0  }
  0x10   :  { %26 = vst.msk [vmem:[#allocation2 + $0x40] sm:$0xf] %vm25_vm0, %v883_v0 }
  0x11 LB: > { %s34_s0 = sld [smem:[#allocation5 + %s876_s23]]  ;;  %s36_s27 = scalar_lea.vmem [#allocation2], %s876_s23  ;;  %s876_s23 = sphi %s874_s23, %s32_s23  }
  0x17   : > { %s35_s26 = scalar_lea.vmem %s1083_s1, %s34_s0 }
  0x18   : > { %v54_v1 = vld [vmem:[%s35_s26] sm:$0x1] }
  0x19   : > { %55 = vst [vmem:[%s36_s27] sm:$0x1] %v54_v1 }
  0x1a   : > { %80 = vsyncadd [#allocation3], 16  ;;  %s32_s23 = sadd.s32 1, %s876_s23  }
  0x1b   : > { %p29_p5 = scmp.ge.s32.totalorder %s32_s23, 64  }
  0x1c   :  { %s878_s28 = smov (%p29_p5), 0  }
  0x1d   :  { %31 = sbr.rel (!%p29_p5) target bundleno = 17 (0x11), region = 88 }
  0x24 LB: > { %870 = dma.done.wait [#allocation3], 16  ;;  %s880_s28 = sphi %s878_s28, %s86_s28  }
  0x25   : > { %871 = vsyncadd [#allocation3], 4294967280  ;;  %s86_s28 = sadd.s32 1, %s880_s28  }
  0x26   : > { %p83_p6 = scmp.ge.s32.totalorder %s86_s28, 64  }
  0x27   :  { %v98_v2 = vld [vmem:[#allocation2 + $0x1] sm:$0xff] (%p83_p6)  ;;  %v99_v3 = vld [vmem:[#allocation2 + $0x9] sm:$0xff] (%p83_p6)  ;;  %706 = vmatprep.subr.bf16.mxu1 (%p83_p6), %v883_v0  ;;  %v884_v9 = vmov (%p83_p6), 0   ;;  %v100_v11 = vld [vmem:[#allocation2 + $0x11] sm:$0xff] (%p83_p6)  ;;  %s885_s1 = smov (%p83_p6), 32   ;;  %s886_s29 = smov (%p83_p6), 96  }
  0x28   :  { %85 = sbr.rel (!%p83_p6) target bundleno = 36 (0x24), region = 99  ;;  %v114_v4 = vld [vmem:[#allocation2 + $0x3] sm:$0xff] (%p83_p6)  ;;  %v746_v5 = vpack.i.bf16 (%p83_p6), %v99_v3, %v98_v2  ;;  %v115_v6 = vld [vmem:[#allocation2 + $0xb] sm:$0xff] (%p83_p6)  ;;  %353 = vmatprep.subr.bf16.mxu0 (%p83_p6), %v884_v9  ;;  %v101_v12 = vld [vmem:[#allocation2 + $0x19] sm:$0xff] (%p83_p6)  ;;  %s887_s30 = smov (%p83_p6), 64   ;;  %vm226_vm1 = vcmask (%p83_p6), 261120  }
  0x29   :  { %v106_v7 = vld [vmem:[#allocation2 + $0x2] sm:$0xff] (%p83_p6)  ;;  %v107_v8 = vld [vmem:[#allocation2 + $0xa] sm:$0xff] (%p83_p6)  ;;  %v756_v10 = vpack.i.bf16 (%p83_p6), %v115_v6, %v114_v4  ;;  %v761_v14 = vpack.i.bf16 (%p83_p6), %v101_v12, %v100_v11  ;;  %v108_v15 = vld [vmem:[#allocation2 + $0x12] sm:$0xff] (%p83_p6)  ;;  %vm235_vm2 = vcmask (%p83_p6), 523264   ;;  %vm244_vm3 = vcmask (%p83_p6), 785408  }
  0x2a   :  { %747 = vrot.lane.b32.xlu0 (%p83_p6), %v746_v5, %s885_s1  ;;  %v751_v13 = vpack.i.bf16 (%p83_p6), %v107_v8, %v106_v7  ;;  %v109_v16 = vld [vmem:[#allocation2 + $0x1a] sm:$0xff] (%p83_p6)  ;;  %v103_v21 = vld [vmem:[#allocation2 + $0x29] sm:$0xff] (%p83_p6)  ;;  %v104_v31 = vld [vmem:[#allocation2 + $0x31] sm:$0xff] (%p83_p6)  ;;  %vm888_vm4 = vmmov (%p83_p6), 0   ;;  %vm446_vm5 = vcmask (%p83_p6), 523520   ;;  %vm474_vm6 = vcmask (%p83_p6), 785920  }
  0x2b   :  { %757 = vrot.lane.b32.xlu1 (%p83_p6), %v756_v10, %s886_s29  ;;  %v116_v17 = vld [vmem:[#allocation2 + $0x13] sm:$0xff] (%p83_p6)  ;;  %v117_v18 = vld [vmem:[#allocation2 + $0x1b] sm:$0xff] (%p83_p6)  ;;  %v766_v19 = vpack.i.bf16 (%p83_p6), %v109_v16, %v108_v15  ;;  %v111_v25 = vld [vmem:[#allocation2 + $0x2a] sm:$0xff] (%p83_p6)  ;;  %718 = vmatprep.mubr.msk.bf16.mxu1 (%p83_p6), %vm888_vm4, %v883_v0  ;;  %vm423_vm7 = vcmask (%p83_p6), 259072   ;;  %vm451_vm8 = vcmask (%p83_p6), 520448   ;;  %vm479_vm9 = vcmask (%p83_p6), 781824  }
  0x2c   :  { %v102_v20 = vld [vmem:[#allocation2 + $0x21] sm:$0xff] (%p83_p6)  ;;  %v771_v23 = vpack.i.bf16 (%p83_p6), %v117_v18, %v116_v17  ;;  %v119_v29 = vld [vmem:[#allocation2 + $0x2b] sm:$0xff] (%p83_p6)  ;;  %v105_v32 = vld [vmem:[#allocation2 + $0x39] sm:$0xff] (%p83_p6)  ;;  %vm504_vm10 = vcmask (%p83_p6), 1041409   ;;  %vm620_vm11 = vcmask (%p83_p6), 74752  }
  0x2d   :  { %v110_v22 = vld [vmem:[#allocation2 + $0x22] sm:$0xff] (%p83_p6)  ;;  %v776_v28 = vpack.i.bf16 (%p83_p6), %v103_v21, %v102_v20  ;;  %v808_v33 = vld [vmem:[%s1084_s2 + $0x10] sm:$0xff] (%p83_p6)   ;;  %v791_v35 = vpack.i.bf16 (%p83_p6), %v105_v32, %v104_v31  ;;  %v113_v37 = vld [vmem:[#allocation2 + $0x3a] sm:$0xff] (%p83_p6) }
  0x2e   :  { %752 = vrot.lane.b32.xlu0 (%p83_p6), %v751_v13, %s887_s30  ;;  %v806_v24 = vld [vmem:[%s1084_s2] sm:$0xff] (%p83_p6)   ;;  %v807_v27 = vld [vmem:[%s1084_s2 + $0x8] sm:$0xff] (%p83_p6)   ;;  %v781_v30 = vpack.i.bf16 (%p83_p6), %v111_v25, %v110_v22  ;;  %v112_v36 = vld [vmem:[#allocation2 + $0x32] sm:$0xff] (%p83_p6) }
  0x2f   :  { %762 = vrot.lane.b32.xlu1 %v761_v14, %s885_s1  ;;  %v118_v26 = vld [vmem:[#allocation2 + $0x23] sm:$0xff]  ;;  %354 = vmatpush1.bf16.msra.mxu0 %v806_v24  ;;  %v120_v38 = vld [vmem:[#allocation2 + $0x33] sm:$0xff]  ;;  %v121_v39 = vld [vmem:[#allocation2 + $0x3b] sm:$0xff]  ;;  %v796_v41 = vpack.i.bf16 %v113_v37, %v112_v36 }
  0x30   :  { %355 = vmatprep.subr.bf16.mxu0 %v884_v9  ;;  %v786_v34 = vpack.i.bf16 %v119_v29, %v118_v26  ;;  %v809_v40 = vld [vmem:[%s1084_s2 + $0x18] sm:$0xff]   ;;  %v122_v42 = vld [vmem:[#allocation2 + $0x4] sm:$0xff]  ;;  %v123_v43 = vld [vmem:[#allocation2 + $0xc] sm:$0xff]  ;;  %v801_v44 = vpack.i.bf16 %v121_v39, %v120_v38 }
  0x31   :  { %v254_v45 = vpack.c.bf16 %v123_v43, %v122_v42  ;;  %v810_v46 = vld [vmem:[%s1084_s2 + $0x20] sm:$0xff]   ;;  %v811_v47 = vld [vmem:[%s1084_s2 + $0x28] sm:$0xff]   ;;  %v812_v48 = vld [vmem:[%s1084_s2 + $0x30] sm:$0xff]  }
  0x32   :  { %767 = vrot.lane.b32.xlu0 %v766_v19, %s887_s30  ;;  %v813_v49 = vld [vmem:[%s1084_s2 + $0x38] sm:$0xff]   ;;  %v814_v50 = vld [vmem:[%s1084_s2 + $0x40] sm:$0xff]   ;;  %v815_v51 = vld [vmem:[%s1084_s2 + $0x48] sm:$0xff]  }
  0x33   :  { %772 = vrot.lane.b32.xlu1 %v771_v23, %s886_s29  ;;  %356 = vmatpush1.bf16.msra.mxu0 %v807_v27  ;;  %v90_v56 = vld [vmem:[#allocation2] sm:$0xff]  ;;  %v91_v57 = vld [vmem:[#allocation2 + $0x8] sm:$0xff]  ;;  %v124_v61 = vld [vmem:[#allocation2 + $0x14] sm:$0xff] }
  0x34   :  { %357 = vmatprep.subr.bf16.mxu0 %v884_v9  ;;  %686 = vmatprep.mubr.msk.bf16.mxu0 %vm226_vm1, %v254_v45  ;;  %v125_v62 = vld [vmem:[#allocation2 + $0x1c] sm:$0xff]  ;;  %v92_v3 = vld [vmem:[#allocation2 + $0x10] sm:$0xff]  ;;  %v95_v29 = vld [vmem:[#allocation2 + $0x28] sm:$0xff] }
  0x35   :  { %v93_v4 = vld [vmem:[#allocation2 + $0x18] sm:$0xff]  ;;  %v256_v11 = vpack.c.bf16 %v125_v62, %v124_v61  ;;  %v94_v26 = vld [vmem:[#allocation2 + $0x20] sm:$0xff]  ;;  %v127_v32 = vld [vmem:[#allocation2 + $0x2c] sm:$0xff] }
  0x36   :  { %777 = vrot.lane.b32.xlu0 %v776_v28, %s885_s1  ;;  %v126_v31 = vld [vmem:[#allocation2 + $0x24] sm:$0xff] }
  0x37   :  { %782 = vrot.lane.b32.xlu1 %v781_v30, %s887_s30  ;;  %358 = vmatpush1.bf16.msra.mxu0 %v808_v33 }
  0x38   :  { %359 = vmatprep.subr.bf16.mxu0 %v884_v9 }
  0x3a   :  { %787 = vrot.lane.b32.xlu0 %v786_v34, %s886_s29 }
  0x3b   :  { %792 = vrot.lane.b32.xlu1 %v791_v35, %s885_s1  ;;  %360 = vmatpush1.bf16.msra.mxu0 %v809_v40  ;;  %v258_v40 = vpack.c.bf16 %v127_v32, %v126_v31 }
  0x3c   :  { %361 = vmatprep.subr.bf16.mxu0 %v884_v9 }
  0x3e   :  { %797 = vrot.lane.b32.xlu0 %v796_v41, %s887_s30 }
  0x3f   :  { %802 = vrot.lane.b32.xlu1 %v801_v44, %s886_s29  ;;  %362 = vmatpush1.bf16.msra.mxu0 %v810_v46 }
  0x40   :  { %363 = vmatprep.subr.bf16.mxu0 %v884_v9 }
  0x43   :  { %364 = vmatpush1.bf16.msra.mxu0 %v811_v47 }
  0x44   :  { %365 = vmatprep.subr.bf16.mxu0 %v884_v9 }
  0x47   :  { %366 = vmatpush1.bf16.msra.mxu0 %v812_v48 }
  0x48   :  { %367 = vmatprep.subr.bf16.mxu0 %v884_v9 }
  0x4b   :  { %368 = vmatpush1.bf16.msra.mxu0 %v813_v49  ;;  %v96_v49 = vld [vmem:[#allocation2 + $0x30] sm:$0xff] }
  0x4c   :  { %369 = vmatprep.subr.bf16.mxu0 %v884_v9 }
  0x4f   :  { %370 = vmatpush1.bf16.msra.mxu0 %v814_v50 }
  0x50   :  { %371 = vmatprep.subr.bf16.mxu0 %v884_v9 }
  0x53   :  { %372 = vmatpush1.bf16.msra.mxu0 %v815_v51  ;;  %v97_v51 = vld [vmem:[#allocation2 + $0x38] sm:$0xff] }
  0x9c   :  { %v748_v52 = vpop.permute.xlu0 %747 }
  0x9d   :  { %v758_v53 = vpop.permute.xlu1 %757  ;;  %v750_v54 = vunpack.i.h.bf16 %v748_v52  ;;  %v749_v55 = vunpack.i.l.bf16 %v748_v52  ;;  %v128_v52 = vld [vmem:[#allocation2 + $0x34] sm:$0xff] }
  0x9e   :  { %v760_v58 = vunpack.i.h.bf16 %v758_v53  ;;  %v759_v59 = vunpack.i.l.bf16 %v758_v53  ;;  %v129_v53 = vld [vmem:[#allocation2 + $0x3c] sm:$0xff] }
  0x9f   :  { %v227_v5 = vsel %vm226_vm1, %v90_v56, %v749_v55  ;;  %v228_v6 = vsel %vm226_vm1, %v91_v57, %v750_v54  ;;  %v260_v61 = vpack.c.bf16 %v129_v53, %v128_v52 }
  0xa0   :  { %v753_v60 = vpop.permute.xlu0 %752 }
  0xa1   :  { %v755_v63 = vunpack.i.h.bf16 %v753_v60  ;;  %v754_v1 = vunpack.i.l.bf16 %v753_v60  ;;  %v763_v2 = vpop.permute.xlu1 %762 }
  0xa2   :  { %v765_v7 = vunpack.i.h.bf16 %v763_v2  ;;  %v764_v8 = vunpack.i.l.bf16 %v763_v2 }
  0xa3   :  { %v236_v9 = vsel %vm235_vm2, %v227_v5, %v754_v1  ;;  %v237_v10 = vsel %vm235_vm2, %v228_v6, %v755_v63 }
  0xa4   :  { %v229_v12 = vsel %vm226_vm1, %v92_v3, %v764_v8  ;;  %v230_v13 = vsel %vm226_vm1, %v93_v4, %v765_v7  ;;  %v768_v14 = vpop.permute.xlu0 %767  ;;  %v245_v15 = vsel %vm244_vm3, %v236_v9, %v759_v59  ;;  %v246_v16 = vsel %vm244_vm3, %v237_v10, %v760_v58  ;;  %v816_v7 = vld [vmem:[%s1085_s3] sm:$0xff]   ;;  %v817_v8 = vld [vmem:[%s1085_s3 + $0x8] sm:$0xff]   ;;  %v818_v9 = vld [vmem:[%s1085_s3 + $0x10] sm:$0xff]  }
  0xa5   :  { %v770_v17 = vunpack.i.h.bf16 %v768_v14  ;;  %v769_v18 = vunpack.i.l.bf16 %v768_v14  ;;  %v773_v19 = vpop.permute.xlu1 %772  ;;  %v253_v20 = vpack.c.bf16 %v246_v16, %v245_v15  ;;  %707 = vmatpush3.bf16.msra.mxu1 %v816_v7  ;;  %v819_v10 = vld [vmem:[%s1085_s3 + $0x18] sm:$0xff]  }
  0xa6   :  { %v775_v21 = vunpack.i.h.bf16 %v773_v19  ;;  %v774_v22 = vunpack.i.l.bf16 %v773_v19  ;;  %708 = vmatprep.subr.bf16.mxu1 %v883_v0 }
  0xa7   :  { %v238_v23 = vsel %vm235_vm2, %v229_v12, %v769_v18  ;;  %v239_v24 = vsel %vm235_vm2, %v230_v13, %v770_v17  ;;  %386 = vmatmul.mubr.bf16.vlgmr.msra.gmra.mrb[0].mxu0 %v253_v20  ;;  %v1031_v12 = vld [vmem:[%s1086_s4] ss:$0 sm:$0xff]  ;;  %v821_v13 = vld [vmem:[%s1085_s3 + $0x28] sm:$0xff]  }
  0xa8   :  { %v778_v25 = vpop.permute.xlu0 %777  ;;  %687 = vmatprep.mubr.msk.bf16.mxu0 %vm226_vm1, %v256_v11  ;;  %v247_v33 = vsel %vm244_vm3, %v238_v23, %v774_v22  ;;  %v248_v34 = vsel %vm244_vm3, %v239_v24, %v775_v21  ;;  %v820_v11 = vld [vmem:[%s1085_s3 + $0x20] sm:$0xff]   ;;  %574 = vrot.lane.b32.xlu0 %v1031_v12, %s885_s1  ;;  %s889_s3 = smov [#allocation6]  }
  0xa9   :  { %v780_v27 = vunpack.i.h.bf16 %v778_v25  ;;  %v779_v28 = vunpack.i.l.bf16 %v778_v25  ;;  %v783_v30 = vpop.permute.xlu1 %782  ;;  %v255_v41 = vpack.c.bf16 %v248_v34, %v247_v33  ;;  %709 = vmatpush3.bf16.msra.mxu1 %v817_v8  ;;  %s640_s4 = sshll.u32 %s889_s3, 4  ;;  %s641_s4 = int_to_ptr.vmem [resolvable:$true] %s640_s4 }
  0xaa   :  { %v785_v35 = vunpack.i.h.bf16 %v783_v30  ;;  %v784_v36 = vunpack.i.l.bf16 %v783_v30  ;;  %710 = vmatprep.subr.bf16.mxu1 %v883_v0  ;;  %s838_s1 = scalar_lea.vmem %s641_s4, 32  ;;  %p843_p8 = scmp.lt.s32.totalorder %s641_s4, %s641_s4 }
  0xab   :  { %v231_v37 = vsel %vm226_vm1, %v94_v26, %v779_v28  ;;  %v232_v38 = vsel %vm226_vm1, %v95_v29, %v780_v27  ;;  %p839_p7 = scmp.ne.s32.totalorder %s641_s4, %s838_s1  ;;  %p844_p9 = scmp.lt.s32.totalorder %s838_s1, %s838_s1 }
  0xac   :  { %v788_v39 = vpop.permute.xlu0 %787  ;;  %v240_v45 = vsel %vm235_vm2, %v231_v37, %v784_v36  ;;  %v241_v46 = vsel %vm235_vm2, %v232_v38, %v785_v35 }
  0xad   :  { %v793_v42 = vpop.permute.xlu1 %792  ;;  %v790_v43 = vunpack.i.h.bf16 %v788_v39  ;;  %v789_v44 = vunpack.i.l.bf16 %v788_v39  ;;  %711 = vmatpush3.bf16.msra.mxu1 %v818_v9  ;;  %p845_p10 = por %p844_p9, %p843_p8 }
  0xae   :  { %v795_v47 = vunpack.i.h.bf16 %v793_v42  ;;  %v794_v48 = vunpack.i.l.bf16 %v793_v42  ;;  %712 = vmatprep.subr.bf16.mxu1 %v883_v0 }
  0xaf   :  { %394 = vmatmul.mubr.bf16.gmra.mrb[4].mxu0 %v255_v41  ;;  %v249_v54 = vsel %vm244_vm3, %v240_v45, %v789_v44  ;;  %v250_v55 = vsel %vm244_vm3, %v241_v46, %v790_v43  ;;  %p846_p11 = pnand %p845_p10, %p839_p7 }
  0xb0   :  { %v798_v50 = vpop.permute.xlu0 %797  ;;  %688 = vmatprep.mubr.msk.bf16.mxu0 %vm226_vm1, %v258_v40  ;;  %v233_v59 = vsel %vm226_vm1, %v96_v49, %v794_v48  ;;  %v234_v60 = vsel %vm226_vm1, %v97_v51, %v795_v47  ;;  %v257_v62 = vpack.c.bf16 %v250_v55, %v249_v54 }
  0xb1   :  { %v800_v56 = vunpack.i.h.bf16 %v798_v50  ;;  %v799_v57 = vunpack.i.l.bf16 %v798_v50  ;;  %v803_v58 = vpop.permute.xlu1 %802  ;;  %713 = vmatpush3.bf16.msra.mxu1 %v819_v10 }
  0xb2   :  { %v805_v63 = vunpack.i.h.bf16 %v803_v58  ;;  %v804_v1 = vunpack.i.l.bf16 %v803_v58  ;;  %714 = vmatprep.subr.bf16.mxu1 %v883_v0 }
  0xb3   :  { %v242_v2 = vsel %vm235_vm2, %v233_v59, %v799_v57  ;;  %v243_v3 = vsel %vm235_vm2, %v234_v60, %v800_v56 }
  0xb4   :  { %v251_v4 = vsel %vm244_vm3, %v242_v2, %v804_v1  ;;  %v252_v5 = vsel %vm244_vm3, %v243_v3, %v805_v63 }
  0xb5   :  { %v259_v6 = vpack.c.bf16 %v252_v5, %v251_v4  ;;  %715 = vmatpush3.bf16.msra.mxu1 %v820_v11 }
  0xb6   :  { %716 = vmatprep.subr.bf16.mxu1 %v883_v0 }
  0xb7   :  { %402 = vmatmul.mubr.bf16.gmra.mrb[8].mxu0 %v257_v62 }
  0xb8   :  { %689 = vmatprep.mubr.msk.bf16.mxu0 %vm226_vm1, %v260_v61 }
  0xb9   :  { %717 = vmatpush3.bf16.msra.mxu1 %v821_v13 }
  0xbf   :  { %410 = vmatmul.mubr.bf16.gmra.mrb[12].mxu0 %v259_v6 }
 0x17a   :  { %v387_v14 = vpop.f32.mrb[0].mxu0 }
 0x17b   :  { %v389_v15 = vpop.f32.mrb[1].mxu0  ;;  %v419_v18 = vsel %vm226_vm1, %v387_v14, -inf  ;;  %v447_v19 = vsel %vm446_vm5, %v387_v14, -inf  ;;  %v475_v20 = vsel %vm474_vm6, %v387_v14, -inf }
 0x17c   :  { %v390_v16 = vpop.f32.mrb[2].mxu0 }
 0x17d   :  { %v392_v17 = vpop.f32.mrb[3].mxu0  ;;  %v420_v22 = vsel %vm226_vm1, %v390_v16, -inf  ;;  %v448_v26 = vsel %vm446_vm5, %v390_v16, -inf  ;;  %v476_v31 = vsel %vm474_vm6, %v390_v16, -inf }
 0x182   :  { %v395_v21 = vpop.f32.mrb[4].mxu0 }
 0x183   :  { %v421_v0 = vsel %vm226_vm1, %v395_v21, -inf  ;;  %v449_v23 = vsel %vm446_vm5, %v395_v21, -inf  ;;  %v477_v24 = vsel %vm474_vm6, %v395_v21, -inf  ;;  %v397_v25 = vpop.f32.mrb[5].mxu0 }
 0x184   :  { %v422_v27 = vmax.f32 %v419_v18, %v421_v0  ;;  %v450_v28 = vmax.f32 %v447_v19, %v449_v23  ;;  %v478_v29 = vmax.f32 %v475_v20, %v477_v24  ;;  %v398_v30 = vpop.f32.mrb[6].mxu0 }
 0x185   :  { %v424_v32 = vsel %vm423_vm7, %v398_v30, -inf  ;;  %v452_v33 = vsel %vm451_vm8, %v398_v30, -inf  ;;  %v480_v34 = vsel %vm479_vm9, %v398_v30, -inf  ;;  %v400_v35 = vpop.f32.mrb[7].mxu0 }
 0x186   :  { %v425_v36 = vmax.f32 %v420_v22, %v424_v32  ;;  %v453_v37 = vmax.f32 %v448_v26, %v452_v33  ;;  %v481_v38 = vmax.f32 %v476_v31, %v480_v34 }
 0x188   :  { %v426_v39 = vmax.f32 %v422_v27, %v425_v36  ;;  %v454_v40 = vmax.f32 %v450_v28, %v453_v37  ;;  %v482_v41 = vmax.f32 %v478_v29, %v481_v38 }
 0x18a   :  { %v403_v42 = vpop.f32.mrb[8].mxu0  ;;  %v427_v46 = vrot.slane %v426_v39, 4  ;;  %v455_v47 = vrot.slane %v454_v40, 4  ;;  %v483_v48 = vrot.slane %v482_v41, 4 }
 0x18b   :  { %v405_v43 = vpop.f32.mrb[9].mxu0  ;;  %v433_v50 = vsel %vm226_vm1, %v403_v42, -inf  ;;  %v461_v51 = vsel %vm446_vm5, %v403_v42, -inf  ;;  %v489_v52 = vsel %vm474_vm6, %v403_v42, -inf }
 0x18c   :  { %v406_v44 = vpop.f32.mrb[10].mxu0  ;;  %v428_v49 = vmax.f32 %v426_v39, %v427_v46  ;;  %v456_v54 = vmax.f32 %v454_v40, %v455_v47  ;;  %v484_v59 = vmax.f32 %v482_v41, %v483_v48 }
 0x18d   :  { %v408_v45 = vpop.f32.mrb[11].mxu0  ;;  %v434_v60 = vsel %vm226_vm1, %v406_v44, -inf  ;;  %v462_v61 = vsel %vm446_vm5, %v406_v44, -inf  ;;  %v490_v6 = vsel %vm474_vm6, %v406_v44, -inf }
 0x18e   :  { %v429_v11 = vrot.slane %v428_v49, 2  ;;  %v457_v13 = vrot.slane %v456_v54, 2  ;;  %v485_v16 = vrot.slane %v484_v59, 2 }
 0x190   :  { %v430_v21 = vmax.f32 %v428_v49, %v429_v11  ;;  %v458_v22 = vmax.f32 %v456_v54, %v457_v13  ;;  %v486_v24 = vmax.f32 %v484_v59, %v485_v16 }
 0x192   :  { %v411_v53 = vpop.f32.mrb[12].mxu0  ;;  %v431_v29 = vrot.slane %v430_v21, 1  ;;  %v459_v30 = vrot.slane %v458_v22, 1  ;;  %v487_v33 = vrot.slane %v486_v24, 1 }
 0x193   :  { %v435_v55 = vsel %vm226_vm1, %v411_v53, -inf  ;;  %v463_v56 = vsel %vm446_vm5, %v411_v53, -inf  ;;  %v491_v57 = vsel %vm474_vm6, %v411_v53, -inf  ;;  %v413_v58 = vpop.f32.mrb[13].mxu0 }
 0x194   :  { %v436_v62 = vmax.f32 %v433_v50, %v435_v55  ;;  %v414_v63 = vpop.f32.mrb[14].mxu0  ;;  %v464_v1 = vmax.f32 %v461_v51, %v463_v56  ;;  %v492_v2 = vmax.f32 %v489_v52, %v491_v57  ;;  %v432_v38 = vmax.f32 %v430_v21, %v431_v29  ;;  %v575_v52 = vpop.permute.xlu0 %574 }
 0x195   :  { %v437_v3 = vsel %vm423_vm7, %v414_v63, -inf  ;;  %v465_v4 = vsel %vm451_vm8, %v414_v63, -inf  ;;  %v416_v5 = vpop.f32.mrb[15].mxu0  ;;  %v493_v9 = vsel %vm479_vm9, %v414_v63, -inf  ;;  %v460_v39 = vmax.f32 %v458_v22, %v459_v30 }
 0x196   :  { %v438_v7 = vmax.f32 %v434_v60, %v437_v3  ;;  %v466_v8 = vmax.f32 %v462_v61, %v465_v4  ;;  %v494_v10 = vmax.f32 %v490_v6, %v493_v9  ;;  %v488_v42 = vmax.f32 %v486_v24, %v487_v33 }
 0x198   :  { %v439_v14 = vmax.f32 %v436_v62, %v438_v7  ;;  %v467_v15 = vmax.f32 %v464_v1, %v466_v8  ;;  %v495_v17 = vmax.f32 %v492_v2, %v494_v10 }
 0x19a   :  { %v440_v18 = vrot.slane %v439_v14, 4  ;;  %v468_v19 = vrot.slane %v467_v15, 4  ;;  %v496_v20 = vrot.slane %v495_v17, 4 }
 0x19c   :  { %v441_v0 = vmax.f32 %v439_v14, %v440_v18  ;;  %v469_v23 = vmax.f32 %v467_v15, %v468_v19  ;;  %v497_v25 = vmax.f32 %v495_v17, %v496_v20 }
 0x19e   :  { %v442_v26 = vrot.slane %v441_v0, 2  ;;  %v470_v27 = vrot.slane %v469_v23, 2  ;;  %v498_v28 = vrot.slane %v497_v25, 2 }
 0x1a0   :  { %v443_v31 = vmax.f32 %v441_v0, %v442_v26  ;;  %v471_v32 = vmax.f32 %v469_v23, %v470_v27  ;;  %v499_v34 = vmax.f32 %v497_v25, %v498_v28 }
 0x1a2   :  { %v444_v35 = vrot.slane %v443_v31, 1  ;;  %v472_v36 = vrot.slane %v471_v32, 1  ;;  %v500_v37 = vrot.slane %v499_v34, 1 }
 0x1a4   :  { %v445_v40 = vmax.f32 %v443_v31, %v444_v35  ;;  %v473_v41 = vmax.f32 %v471_v32, %v472_v36  ;;  %v501_v43 = vmax.f32 %v499_v34, %v500_v37 }
 0x1a6   :  { %v505_v44 = vsel %vm504_vm10, %v445_v40, %v432_v38  ;;  %v509_v45 = vsel %vm504_vm10, %v473_v41, %v460_v39  ;;  %v513_v46 = vsel %vm504_vm10, %v501_v43, %v488_v42 }
 0x1a7   :  { %v515_v47 = vsel %vm226_vm1, %v505_v44, %v509_v45 }
 0x1a8   :  { %v516_v48 = vsel %vm235_vm2, %v515_v47, %v513_v46 }
 0x1a9   :  { %v523_v49 = vadd.f32 %v1031_v12, %v516_v48 }
 0x1ab   :  { %v524_v50 = vmax.f32 %v523_v49, 0.0 }
 0x1ad   :  { %v525_v51 = vpack.c.bf16 %v524_v50, %v524_v50 }
 0x1af   :  { %719 = vmatmul.mubr.msk.bf16.vlgmr.msra.gmra.mrb[0].mxu1 %vm244_vm3, %v525_v51 }
 0x282   :  { %v614_v53 = vpop.f32.mrb[0].mxu1 }
 0x283   :  { %v615_v54 = vadd.f32 %v614_v53, %v575_v52  ;;  %v720_v55 = vpop.f32.mrb[1].mxu1 }
 0x284   :  { %v617_v56 = vpop.f32.mrb[2].mxu1 }
 0x285   :  { %v721_v57 = vpop.f32.mrb[3].mxu1  ;;  %v621_v58 = vsel %vm620_vm11, %v615_v54, -inf }
 0x286   :  { %622 = vmax.xlane.f32.xlu1 %v621_v58 }
 0x313   :  { %v623_v59 = vpop.xlane.xlu1 %622 }
 0x314   :  { %v624_v60 = vsub.f32 %v615_v54, %v623_v59 }
 0x316   :  { %v625_v61 = vmul.f32 1.442695, %v624_v60 }
 0x318   :  { %822 = vpow2.f32 %v625_v61 }
 0x322   :  { %v823_v62 = vpop.eup %822 }
 0x323   :  { %v627_v12 = vsel %vm620_vm11, %v823_v62, 0.0 }
 0x324   :  { %628 = vadd.xlane.f32.xlu0 %v627_v12 }
 0x3b1   :  { %v629_v63 = vpop.xlane.xlu0 %628 }
 0x3b2   :  { %824 = vlog2.f32 %v629_v63 }
 0x3bc   :  { %v825_v1 = vpop.eup %824 }
 0x3bd   :  { %v631_v2 = vmul.f32 0.6931472, %v825_v1 }
 0x3bf   :  { %v632_v3 = vsub.f32 %v624_v60, %v631_v2 }
 0x3c1   :  { %633 = vst.msk [vmem:[#allocation6] sm:$0x3] %vm620_vm11, %v632_v3 }
 0x3c2   :  { %849 = shalt.err (!%p846_p11)
}
 0x3c3   :  { %s850_s15 = scalar_lea.hbm %s1087_s5, 32 }
 0x3c4   :  { %p851_p12 = scmp.ne.s32.totalorder %s1087_s5, %s850_s15  ;;  %p854_p13 = scmp.lt.u32.totalorder %s850_s15, %s1087_s5 }
 0x3c6   :  { %p856_p0 = pnand %p854_p13, %p851_p12 }
 0x3c8   :  { %859 = shalt.err (!%p856_p0)
}
 0x3c9   :  { %643 = dma.vmem_to_hbm [thread:$0]  %s641_s4, 32, %s1087_s5, [#allocation7]  }
 0x3ca   :  { %872 = dma.done.wait [#allocation7], 32  }
 0x3cb   :  { %873 = vsyncadd [#allocation7], 4294967264 }
 0x3cc   :  { %647 = vsyncpa [#allocation7], 1 }
 0x3cd   :  { %648 = vsyncmov [#allocation3] }
 0x3d0   :  { %s649_s22 = vpop.sfrf %648 }
 0x3d1   :  { %p698_p1 = scmp.ne.s32.totalorder %s649_s22, 0 }
 0x3d3   :  { %653 = shalt.err (%p698_p1)  }

</bundles_post_ra>
